<compile_context>
chip_gen: v5e
topology: v5e:2x2
jax: 0.10.0
libtpu: 0.0.40
codegen_flags: <defaults>
</compile_context>

<pallas_src>
import functools

import jax
import jax.numpy as jnp
from jax.experimental import pallas as pl
from jax.experimental.pallas import tpu as pltpu


# ----------------------------------------------------------------------------
# Small helpers
# ----------------------------------------------------------------------------

def _compiler_params(**kwargs):
    """pltpu.CompilerParams with a defensive fallback for older JAX releases."""
    cls = getattr(pltpu, "CompilerParams", None)
    if cls is None:
        return None
    try:
        return cls(**kwargs)
    except TypeError:
        return None


def _tpu_vmem_capacity():
    """Physical VMEM per TensorCore (bytes); conservative default if unknown."""
    try:
        info = pltpu.get_tpu_info()
        v = getattr(info, "vmem_capacity_bytes", None)
        if v:
            return int(v)
    except Exception:
        pass
    return 64 * 1024 * 1024  # assume v7x-like (smallest) if we cannot query


def _largest_divisor(n, cap):
    """Largest divisor of n that is <= cap (>= 1)."""
    cap = max(1, min(n, cap))
    for d in range(cap, 0, -1):
        if n % d == 0:
            return d
    return 1


def _pick_row_tile(h, cap):
    """Largest divisor of h that is a multiple of 8 and <= cap.

    Falls back to the full extent h (always a legal block shape) if no
    8-aligned divisor exists, so the (8,128) BlockSpec rule is never violated.
    """
    if h <= cap:
        return h
    start = cap - (cap % 8)
    for t in range(start, 0, -8):
        if h % t == 0:
            return t
    return h


# ----------------------------------------------------------------------------
# MSE mask-selection kernel
# ----------------------------------------------------------------------------

def _mse_kernel(masks_ref, ref_ref, o_ref):
    """masks_ref: (K, tr, 128), ref_ref: (1, tr, 128); o_ref: (K, 128) resident
    per-lane accumulator.  Final cross-lane reduce + 1/P scale happens outside."""
    @pl.when(pl.program_id(0) == 0)
    def _init():
        o_ref[...] = jnp.zeros_like(o_ref)

    d = masks_ref[...].astype(jnp.float32) - ref_ref[...].astype(jnp.float32)
    o_ref[...] += jnp.sum(d * d, axis=1)        # (K, tr, 128) -> (K, 128)


def mask_mse_pallas(masks, ref_mask):
    """masks: (K, H, W) binary, ref_mask: (H, W) binary -> (K,) f32 MSE.

    The flattened pixel axis is zero-padded to a multiple of 8*128 and laid out
    as (rows, 128) so every block is sublane/lane dense and the reduce-tile size
    is always a legal multiple of 8 (padding contributes 0 to the squared diff).
    """
    K, H, W = masks.shape
    P = H * W
    LANE, SUB = 128, 8
    tile = LANE * SUB
    Ppad = ((P + tile - 1) // tile) * tile
    rows = Ppad // LANE                          # multiple of 8 by construction

    mflat = masks.reshape(K, P)
    rflat = ref_mask.reshape(1, P)
    if Ppad != P:
        mflat = jnp.pad(mflat, ((0, 0), (0, Ppad - P)))
        rflat = jnp.pad(rflat, ((0, 0), (0, Ppad - P)))
    m3 = mflat.reshape(K, rows, LANE)
    r3 = rflat.reshape(1, rows, LANE)

    # Big tiles -> few grid steps (per-step overhead dominates this tiny kernel).
    cap_rows = 2048                              # 2048*128 = 256K elems per K slice
    if rows <= cap_rows:
        tr = rows
    else:
        tr = SUB * _largest_divisor(rows // SUB, cap_rows // SUB)

    out = pl.pallas_call(
        _mse_kernel,
        out_shape=jax.ShapeDtypeStruct((K, LANE), jnp.float32),
        grid=(rows // tr,),
        in_specs=[
            pl.BlockSpec((K, tr, LANE), lambda i: (0, i, 0)),
            pl.BlockSpec((1, tr, LANE), lambda i: (0, i, 0)),
        ],
        out_specs=pl.BlockSpec((K, LANE), lambda i: (0, 0)),
        compiler_params=_compiler_params(dimension_semantics=("arbitrary",)),
    )(m3, r3)
    return jnp.sum(out, axis=1) * (1.0 / P)


# ----------------------------------------------------------------------------
# Dilation (+ fused bounding box) kernels
# ----------------------------------------------------------------------------

def _window_max(a, k, axis):
    """b[i] = max(a[i .. i+k-1]) along `axis` via log-doubling (ceil(log2 k) steps)."""
    # TODO(synk): the shifted slices could use pltpu.roll + edge masking (XLU slot)
    # instead of relayout copies; kept as slices for guaranteed lowering on all gens.
    length = 1
    while length < k:
        step = min(length, k - length)
        n = a.shape[axis] - step
        if axis == 0:
            a = jnp.maximum(a[:n, :], a[step:step + n, :])
        else:
            a = jnp.maximum(a[:, :n], a[:, step:step + n])
        length += step
    return a


def _dilate_value(mpad_ref, k):
    """Separable square dilation (max filter) of a zero-padded binary mask.

    All math in f32 (fast path on v5e; negligible cost on v6e/v7x)."""
    a = mpad_ref[...].astype(jnp.float32)
    a = _window_max(a, k, axis=0)   # rows
    a = _window_max(a, k, axis=1)   # cols
    return a


def _bbox_lanes(m):
    """cv2.boundingRect of a binary f32 value; lanes 0..3 hold (x, y, w, h)."""
    H, W = m.shape
    col_any = jnp.max(m, axis=0, keepdims=True) > 0.0   # (1, W)
    row_any = jnp.max(m, axis=1, keepdims=True) > 0.0   # (H, 1)
    cols = jax.lax.broadcasted_iota(jnp.int32, (1, W), 1)
    rows = jax.lax.broadcasted_iota(jnp.int32, (H, 1), 0)
    big = jnp.int32(1 << 30)
    cmin = jnp.min(jnp.where(col_any, cols, big), keepdims=True)
    cmax = jnp.max(jnp.where(col_any, cols, -1), keepdims=True)
    rmin = jnp.min(jnp.where(row_any, rows, big), keepdims=True)
    rmax = jnp.max(jnp.where(row_any, rows, -1), keepdims=True)
    nonempty = rmax >= 0
    x = jnp.where(nonempty, cmin, 0)
    y = jnp.where(nonempty, rmin, 0)
    w = jnp.where(nonempty, cmax - cmin + 1, 0)
    h = jnp.where(nonempty, rmax - rmin + 1, 0)
    lane = jax.lax.broadcasted_iota(jnp.int32, (1, 128), 1)
    return jnp.where(lane == 0, x,
           jnp.where(lane == 1, y,
           jnp.where(lane == 2, w,
           jnp.where(lane == 3, h, 0))))


def _dilate_kernel(mpad_ref, o_ref, *, k):
    o_ref[...] = _dilate_value(mpad_ref, k).astype(o_ref.dtype)


def _dilate_box_kernel(mpad_ref, o_ref, box_ref, *, k):
    a = _dilate_value(mpad_ref, k)
    o_ref[...] = a.astype(o_ref.dtype)
    box_ref[...] = _bbox_lanes(a)


def _bbox_kernel(m_ref, o_ref):
    o_ref[...] = _bbox_lanes(m_ref[...].astype(jnp.float32))


def _pad_for_dilation(mask, k):
    pad_lo = k // 2                 # cv2.dilate default (centered) anchor
    pad_hi = k - 1 - pad_lo
    return jnp.pad(mask, ((pad_lo, pad_hi), (pad_lo, pad_hi)))


def dilate_mask_pallas(mask, kernel_size):
    H, W = mask.shape
    k = int(kernel_size)
    if k <= 1:
        return mask
    mpad = _pad_for_dilation(mask, k)
    return pl.pallas_call(
        functools.partial(_dilate_kernel, k=k),
        out_shape=jax.ShapeDtypeStruct((H, W), mask.dtype),
        grid=(1,),
        in_specs=[pl.BlockSpec(mpad.shape, lambda i: (0, 0))],
        out_specs=pl.BlockSpec((H, W), lambda i: (0, 0)),
    )(mpad)


def dilate_and_box_pallas(mask, kernel_size):
    """Fused dilation + bounding rect (one launch, mask stays resident in VMEM)."""
    H, W = mask.shape
    k = int(kernel_size)
    if k <= 1:
        return mask, get_box_from_mask_pallas(mask)
    mpad = _pad_for_dilation(mask, k)
    dil, box = pl.pallas_call(
        functools.partial(_dilate_box_kernel, k=k),
        out_shape=(jax.ShapeDtypeStruct((H, W), mask.dtype),
                   jax.ShapeDtypeStruct((1, 128), jnp.int32)),
        grid=(1,),
        in_specs=[pl.BlockSpec(mpad.shape, lambda i: (0, 0))],
        out_specs=(pl.BlockSpec((H, W), lambda i: (0, 0)),
                   pl.BlockSpec((1, 128), lambda i: (0, 0))),
    )(mpad)
    return dil, box[0, :4]


def get_box_from_mask_pallas(mask):
    H, W = mask.shape
    out = pl.pallas_call(
        _bbox_kernel,
        out_shape=jax.ShapeDtypeStruct((1, 128), jnp.int32),
        grid=(1,),
        in_specs=[pl.BlockSpec((H, W), lambda i: (0, 0))],
        out_specs=pl.BlockSpec((1, 128), lambda i: (0, 0)),
    )(mask)
    return out[0, :4]  # (x, y, w, h)


# ----------------------------------------------------------------------------
# Inpaint (masked-region removal) kernel — lane-dense (T, H-tile, W*C) layout
# ----------------------------------------------------------------------------

def _inpaint_fill_kernel(f_ref, m_ref, o_ref):
    # TODO(synk): the STTN video-inpainting transformer is an external pretrained
    # network; only the masked-region removal hot path is implemented here.
    keep = 1.0 - m_ref[...].astype(jnp.float32)   # (1, th, W*C), lane-dense
    o_ref[...] = f_ref[...] * keep


def inpaint_fill_pallas(frames, masks):
    """frames: (T, H, W, C) float, masks: (T, H, W) binary (bf16 or f32)."""
    T, H, W, C = frames.shape
    WC = W * C
    frames_f = frames if frames.dtype == jnp.float32 else frames.astype(jnp.float32)
    fflat = frames_f.reshape(T, H, WC)             # contiguous -> free reshape
    # Lane-dense mask: broadcast the per-pixel keep factor across channels in bf16
    # (small extra HBM traffic); every block's trailing dim is the full W*C extent,
    # so blocks are lane-dense at real resolutions and always legal at toy sizes.
    mflat = jnp.broadcast_to(masks[..., None].astype(jnp.bfloat16),
                             (T, H, W, C)).reshape(T, H, WC)

    # Generation-aware tile size / VMEM limit:
    #   v5e/v6e (128 MiB VMEM): big row tiles (<=512), 64 MiB scoped limit.
    #   v7x     ( 64 MiB VMEM): <=256-row tiles, 48 MiB limit (leave scratch headroom).
    vmem_phys = _tpu_vmem_capacity()
    if vmem_phys >= 100 * 1024 * 1024:
        row_cap, vmem_limit = 512, 64 * 1024 * 1024
    else:
        row_cap, vmem_limit = 256, 48 * 1024 * 1024
    bytes_per_row = (4 + 4 + 2) * WC               # f32 in + f32 out + bf16 mask
    max_rows = max(8, (vmem_limit // 2) // (2 * bytes_per_row))  # double-buffered
    th = _pick_row_tile(H, cap=min(row_cap, max_rows))

    out = pl.pallas_call(
        _inpaint_fill_kernel,
        out_shape=jax.ShapeDtypeStruct((T, H, WC), jnp.float32),
        grid=(T, H // th),
        in_specs=[
            pl.BlockSpec((1, th, WC), lambda t, i: (t, i, 0)),
            pl.BlockSpec((1, th, WC), lambda t, i: (t, i, 0)),
        ],
        out_specs=pl.BlockSpec((1, th, WC), lambda t, i: (t, i, 0)),
        input_output_aliases={0: 0},               # write result into the frames buffer
        compiler_params=_compiler_params(
            dimension_semantics=("parallel", "parallel"),
            vmem_limit_bytes=vmem_limit),
    )(fflat, mflat)
    return out.reshape(T, H, W, C)


# ----------------------------------------------------------------------------
# Module re-implementation
# ----------------------------------------------------------------------------

class RemoveAnythingVideoPallas:
    """Forward pass of RemoveAnythingVideo with Pallas TPU kernels for the hot paths."""

    def __init__(self, seed=0, num_candidate_masks=3):
        # TODO(synk): OSTrack tracker / SAM segmentor / STTN inpainter are external
        # pretrained networks in the original module; deterministic synthetic
        # stand-ins are used here (their numeric hot paths run as Pallas kernels).
        self._seed = seed
        self.K = num_candidate_masks
        self._jit_forward = jax.jit(
            self._forward_impl,
            static_argnames=("key_frame_mask_idx", "dilate_kernel_size"))

    # ---- synthetic stand-ins for the external networks ----------------------
    def forward_segmentor(self, img, point_coords=None, point_labels=None,
                          box=None, mask_input=None, multimask_output=True,
                          return_logits=False, frame_idx=0):
        # Deterministic per-frame proposals seeded by the (possibly traced) frame
        # index, so the whole per-frame loop stays on-device inside lax.scan.
        H, W = img.shape[0], img.shape[1]
        k = jax.random.fold_in(jax.random.PRNGKey(self._seed), frame_idx)
        k1, k2, k3 = jax.random.split(k, 3)
        centers = jax.random.randint(k1, (self.K, 2), 3, min(H, W) - 3)
        radii = jax.random.randint(k2, (self.K,), 2, 5)
        rows = jnp.arange(H)[None, :, None]
        cols = jnp.arange(W)[None, None, :]
        masks = ((jnp.abs(rows - centers[:, 0][:, None, None]) <= radii[:, None, None]) &
                 (jnp.abs(cols - centers[:, 1][:, None, None]) <= radii[:, None, None])
                 ).astype(jnp.bfloat16)            # binary masks kept in bf16
        scores = jax.random.uniform(k3, (self.K,), jnp.float32)
        return masks, scores

    def forward_tracker(self, frames, init_box):
        # TODO(synk): OSTrack tracking network not translated; constant-velocity boxes.
        T, H, W = frames.shape[0], frames.shape[1], frames.shape[2]
        t = jnp.arange(T, dtype=init_box.dtype)
        x = jnp.clip(init_box[0] + t, 0, W - 1)
        y = jnp.clip(init_box[1] + t, 0, H - 1)
        w = jnp.broadcast_to(init_box[2], (T,))
        h = jnp.broadcast_to(init_box[3], (T,))
        return jnp.stack([x, y, w, h], axis=1)     # (T, 4)

    def forward_inpainter(self, frames, masks):
        return inpaint_fill_pallas(frames, masks)

    # ---- module-native numeric ops (Pallas) ---------------------------------
    def mask_selection(self, masks, scores, ref_mask=None, interactive=False):
        if interactive:
            raise NotImplementedError
        if ref_mask is not None:
            mse = mask_mse_pallas(masks, ref_mask)      # Pallas tiled MSE reduction
            idx = jnp.argmin(mse)
        else:
            idx = jnp.argmax(scores)
        return jnp.take(masks, idx, axis=0)

    @staticmethod
    def get_box_from_mask(mask):
        return get_box_from_mask_pallas(mask)           # Pallas bounding-rect

    # ---- traced forward body -------------------------------------------------
    def _forward_impl(self, frames, key_frame_point_coords, key_frame_point_labels,
                      key_frame_mask_idx, dilate_kernel_size):
        T = frames.shape[0]
        key_frame = frames[0]
        key_masks, key_scores = self.forward_segmentor(
            key_frame, key_frame_point_coords, key_frame_point_labels, frame_idx=0)
        if key_frame_mask_idx is not None:
            key_mask = key_masks[key_frame_mask_idx]
        else:
            key_mask = self.mask_selection(key_masks, key_scores)
        if dilate_kernel_size is not None:
            # Fused dilation + bounding rect (one launch, no extra HBM round trip).
            key_mask, key_box = dilate_and_box_pallas(key_mask, dilate_kernel_size)
        else:
            key_box = get_box_from_mask_pallas(key_mask)

        all_box = self.forward_tracker(frames, key_box)   # (T, 4) int32

        # Per-frame segment -> select -> dilate loop as a single lax.scan
        # (ref_mask is the carry), killing per-frame dispatch overhead.
        def per_frame(ref_mask, xs):
            t, frame, box = xs
            sam_box = jnp.stack([box[0], box[1], box[0] + box[2], box[1] + box[3]])
            masks, scores = self.forward_segmentor(frame, box=sam_box, frame_idx=t)
            mask = self.mask_selection(masks, scores, ref_mask)
            if dilate_kernel_size is not None:
                mask = dilate_mask_pallas(mask, dilate_kernel_size)
            return mask, mask

        if T > 1:
            ts = jnp.arange(1, T, dtype=jnp.int32)
            _, rest_masks = jax.lax.scan(per_frame, key_mask,
                                         (ts, frames[1:], all_box[1:]))
            mask_stack = jnp.concatenate([key_mask[None], rest_masks], axis=0)
        else:
            mask_stack = key_mask[None]

        out_frames = self.forward_inpainter(frames, mask_stack)
        return out_frames, mask_stack.astype(jnp.float32), all_box

    # ---- public forward ------------------------------------------------------
    def forward(self, frames, key_frame_idx, key_frame_point_coords,
                key_frame_point_labels, key_frame_mask_idx=None,
                dilate_kernel_size=15):
        assert key_frame_idx == 0, "Only support key frame at the beginning."
        return self._jit_forward(frames, key_frame_point_coords, key_frame_point_labels,
                                 key_frame_mask_idx=key_frame_mask_idx,
                                 dilate_kernel_size=dilate_kernel_size)


# ----------------------------------------------------------------------------
# Main
# ----------------------------------------------------------------------------

if __name__ == "__main__":
    key = jax.random.PRNGKey(0)
    T, H, W, C = 4, 16, 16, 3
    frames = jax.random.uniform(key, (T, H, W, C), jnp.float32, 0.0, 255.0)
    point_coords = jnp.array([[8.0, 8.0]], dtype=jnp.float32)
    point_labels = jnp.array([1], dtype=jnp.int32)

    model = RemoveAnythingVideoPallas(seed=0)
    all_frame, all_mask, all_box = model.forward(
        frames,
        key_frame_idx=0,
        key_frame_point_coords=point_coords,
        key_frame_point_labels=point_labels,
        key_frame_mask_idx=None,
        dilate_kernel_size=5,
    )
    jax.block_until_ready((all_frame, all_mask, all_box))
    assert all_frame.shape == (T, H, W, C)
    assert all_mask.shape == (T, H, W)
    assert all_box.shape == (T, 4)
    print("KERNEL_OK")
</pallas_src>

<mosaic_0001>
module attributes {stable_mosaic.version = 11 : i64} {
  func.func @_dilate_box_kernel(%arg0: i32, %arg1: memref<20x20xbf16, #tpu.memory_space<vmem>>, %arg2: memref<16x16xbf16, #tpu.memory_space<vmem>>, %arg3: memref<1x128xi32, #tpu.memory_space<vmem>>) attributes {dimension_semantics = [#tpu.dimension_semantics<arbitrary>], iteration_bounds = array<i64: 1>, scalar_prefetch = 0 : i64, scratch_operands = 0 : i64, tpu.core_type = #tpu.core_type<tc>, window_params = [{pipeline_mode = #tpu.pipeline_mode<synchronous>, transform_indices = @transform_0, window_bounds = array<i64: 20, 20>}, {pipeline_mode = #tpu.pipeline_mode<synchronous>, transform_indices = @transform_1, window_bounds = array<i64: 16, 16>}, {pipeline_mode = #tpu.pipeline_mode<synchronous>, transform_indices = @transform_2, window_bounds = array<i64: 1, 128>}]} {
    %c0 = arith.constant 0 : index
    %c0_0 = arith.constant 0 : index
    %0 = vector.load %arg1[%c0, %c0_0] : memref<20x20xbf16, #tpu.memory_space<vmem>>, vector<20x20xbf16>
    %1 = arith.extf %0 : vector<20x20xbf16> to vector<20x20xf32>
    %2 = vector.extract_strided_slice %1 {offsets = [0, 0], sizes = [19, 20], strides = [1, 1]} : vector<20x20xf32> to vector<19x20xf32>
    %3 = vector.extract_strided_slice %1 {offsets = [1, 0], sizes = [19, 20], strides = [1, 1]} : vector<20x20xf32> to vector<19x20xf32>
    %4 = arith.maximumf %2, %3 : vector<19x20xf32>
    %5 = vector.extract_strided_slice %4 {offsets = [0, 0], sizes = [17, 20], strides = [1, 1]} : vector<19x20xf32> to vector<17x20xf32>
    %6 = vector.extract_strided_slice %4 {offsets = [2, 0], sizes = [17, 20], strides = [1, 1]} : vector<19x20xf32> to vector<17x20xf32>
    %7 = arith.maximumf %5, %6 : vector<17x20xf32>
    %8 = vector.extract_strided_slice %7 {offsets = [0, 0], sizes = [16, 20], strides = [1, 1]} : vector<17x20xf32> to vector<16x20xf32>
    %9 = vector.extract_strided_slice %7 {offsets = [1, 0], sizes = [16, 20], strides = [1, 1]} : vector<17x20xf32> to vector<16x20xf32>
    %10 = arith.maximumf %8, %9 : vector<16x20xf32>
    %11 = vector.extract_strided_slice %10 {offsets = [0, 0], sizes = [16, 19], strides = [1, 1]} : vector<16x20xf32> to vector<16x19xf32>
    %12 = vector.extract_strided_slice %10 {offsets = [0, 1], sizes = [16, 19], strides = [1, 1]} : vector<16x20xf32> to vector<16x19xf32>
    %13 = arith.maximumf %11, %12 : vector<16x19xf32>
    %14 = vector.extract_strided_slice %13 {offsets = [0, 0], sizes = [16, 17], strides = [1, 1]} : vector<16x19xf32> to vector<16x17xf32>
    %15 = vector.extract_strided_slice %13 {offsets = [0, 2], sizes = [16, 17], strides = [1, 1]} : vector<16x19xf32> to vector<16x17xf32>
    %16 = arith.maximumf %14, %15 : vector<16x17xf32>
    %17 = vector.extract_strided_slice %16 {offsets = [0, 0], sizes = [16, 16], strides = [1, 1]} : vector<16x17xf32> to vector<16x16xf32>
    %18 = vector.extract_strided_slice %16 {offsets = [0, 1], sizes = [16, 16], strides = [1, 1]} : vector<16x17xf32> to vector<16x16xf32>
    %19 = arith.maximumf %17, %18 : vector<16x16xf32>
    %20 = arith.truncf %19 : vector<16x16xf32> to vector<16x16xbf16>
    %c0_1 = arith.constant 0 : index
    %c0_2 = arith.constant 0 : index
    %21 = vector.load %arg2[%c0_1, %c0_2] : memref<16x16xbf16, #tpu.memory_space<vmem>>, vector<16x16xbf16>
    tpu.vector_store %arg2[%c0_1, %c0_2], %20 {strides = array<i32>} : memref<16x16xbf16, #tpu.memory_space<vmem>>, vector<16x16xbf16>,
    %cst = arith.constant dense<0xFF800000> : vector<16xf32>
    %22 = vector.multi_reduction <maximumf>, %19, %cst [0] : vector<16x16xf32> to vector<16xf32>
    %23 = vector.shape_cast %22 : vector<16xf32> to vector<1x16xf32>
    %cst_3 = arith.constant 0.000000e+00 : f32
    %24 = vector.broadcast %cst_3 : f32 to vector<1x16xf32>
    %25 = arith.cmpf ogt, %23, %24 : vector<1x16xf32>
    %cst_4 = arith.constant dense<0xFF800000> : vector<16xf32>
    %26 = vector.multi_reduction <maximumf>, %19, %cst_4 [1] : vector<16x16xf32> to vector<16xf32>
    %27 = vector.shape_cast %26 : vector<16xf32> to vector<16x1xf32>
    %cst_5 = arith.constant 0.000000e+00 : f32
    %28 = vector.broadcast %cst_5 : f32 to vector<16x1xf32>
    %29 = arith.cmpf ogt, %27, %28 : vector<16x1xf32>
    %30 = tpu.iota {dimensions = array<i32: 1>} : vector<1x16xi32>
    %31 = tpu.iota {dimensions = array<i32: 0>} : vector<16x1xi32>
    %c1073741824_i32 = arith.constant 1073741824 : i32
    %32 = vector.broadcast %c1073741824_i32 : i32 to vector<1x16xi32>
    %33 = arith.select %25, %30, %32 : vector<1x16xi1>, vector<1x16xi32>
    %34 = vector.shape_cast %33 : vector<1x16xi32> to vector<1x1x16xi32>
    %cst_6 = arith.constant dense<2147483647> : vector<1xi32>
    %35 = vector.multi_reduction <minsi>, %34, %cst_6 [1, 2] : vector<1x1x16xi32> to vector<1xi32>
    %36 = vector.shape_cast %35 : vector<1xi32> to vector<1x1x1xi32>
    %37 = vector.extract %36[0, 0, 0] : i32 from vector<1x1x1xi32>
    %38 = vector.broadcast %37 : i32 to vector<1x1xi32>
    %c-1_i32 = arith.constant -1 : i32
    %39 = vector.broadcast %c-1_i32 : i32 to vector<1x16xi32>
    %40 = arith.select %25, %30, %39 : vector<1x16xi1>, vector<1x16xi32>
    %41 = vector.shape_cast %40 : vector<1x16xi32> to vector<1x1x16xi32>
    %cst_7 = arith.constant dense<-2147483648> : vector<1xi32>
    %42 = vector.multi_reduction <maxsi>, %41, %cst_7 [1, 2] : vector<1x1x16xi32> to vector<1xi32>
    %43 = vector.shape_cast %42 : vector<1xi32> to vector<1x1x1xi32>
    %44 = vector.extract %43[0, 0, 0] : i32 from vector<1x1x1xi32>
    %45 = vector.broadcast %44 : i32 to vector<1x1xi32>
    %c1073741824_i32_8 = arith.constant 1073741824 : i32
    %46 = vector.broadcast %c1073741824_i32_8 : i32 to vector<16x1xi32>
    %47 = arith.select %29, %31, %46 : vector<16x1xi1>, vector<16x1xi32>
    %48 = vector.shape_cast %47 : vector<16x1xi32> to vector<1x16x1xi32>
    %cst_9 = arith.constant dense<2147483647> : vector<1xi32>
    %49 = vector.multi_reduction <minsi>, %48, %cst_9 [1, 2] : vector<1x16x1xi32> to vector<1xi32>
    %50 = vector.shape_cast %49 : vector<1xi32> to vector<1x1x1xi32>
    %51 = vector.extract %50[0, 0, 0] : i32 from vector<1x1x1xi32>
    %52 = vector.broadcast %51 : i32 to vector<1x1xi32>
    %c-1_i32_10 = arith.constant -1 : i32
    %53 = vector.broadcast %c-1_i32_10 : i32 to vector<16x1xi32>
    %54 = arith.select %29, %31, %53 : vector<16x1xi1>, vector<16x1xi32>
    %55 = vector.shape_cast %54 : vector<16x1xi32> to vector<1x16x1xi32>
    %cst_11 = arith.constant dense<-2147483648> : vector<1xi32>
    %56 = vector.multi_reduction <maxsi>, %55, %cst_11 [1, 2] : vector<1x16x1xi32> to vector<1xi32>
    %57 = vector.shape_cast %56 : vector<1xi32> to vector<1x1x1xi32>
    %58 = vector.extract %57[0, 0, 0] : i32 from vector<1x1x1xi32>
    %59 = vector.broadcast %58 : i32 to vector<1x1xi32>
    %c0_i32 = arith.constant 0 : i32
    %60 = vector.broadcast %c0_i32 : i32 to vector<1x1xi32>
    %61 = arith.cmpi sge, %59, %60 : vector<1x1xi32>
    %c0_i32_12 = arith.constant 0 : i32
    %62 = vector.broadcast %c0_i32_12 : i32 to vector<1x1xi32>
    %63 = arith.select %61, %38, %62 : vector<1x1xi1>, vector<1x1xi32>
    %c0_i32_13 = arith.constant 0 : i32
    %64 = vector.broadcast %c0_i32_13 : i32 to vector<1x1xi32>
    %65 = arith.select %61, %52, %64 : vector<1x1xi1>, vector<1x1xi32>
    %66 = arith.subi %45, %38 : vector<1x1xi32>
    %c1_i32 = arith.constant 1 : i32
    %67 = vector.broadcast %c1_i32 : i32 to vector<1x1xi32>
    %68 = arith.addi %66, %67 : vector<1x1xi32>
    %c0_i32_14 = arith.constant 0 : i32
    %69 = vector.broadcast %c0_i32_14 : i32 to vector<1x1xi32>
    %70 = arith.select %61, %68, %69 : vector<1x1xi1>, vector<1x1xi32>
    %71 = arith.subi %59, %52 : vector<1x1xi32>
    %c1_i32_15 = arith.constant 1 : i32
    %72 = vector.broadcast %c1_i32_15 : i32 to vector<1x1xi32>
    %73 = arith.addi %71, %72 : vector<1x1xi32>
    %c0_i32_16 = arith.constant 0 : i32
    %74 = vector.broadcast %c0_i32_16 : i32 to vector<1x1xi32>
    %75 = arith.select %61, %73, %74 : vector<1x1xi1>, vector<1x1xi32>
    %76 = tpu.iota {dimensions = array<i32: 1>} : vector<1x128xi32>
    %c0_i32_17 = arith.constant 0 : i32
    %77 = vector.broadcast %c0_i32_17 : i32 to vector<1x128xi32>
    %78 = arith.cmpi eq, %76, %77 : vector<1x128xi32>
    %c1_i32_18 = arith.constant 1 : i32
    %79 = vector.broadcast %c1_i32_18 : i32 to vector<1x128xi32>
    %80 = arith.cmpi eq, %76, %79 : vector<1x128xi32>
    %c2_i32 = arith.constant 2 : i32
    %81 = vector.broadcast %c2_i32 : i32 to vector<1x128xi32>
    %82 = arith.cmpi eq, %76, %81 : vector<1x128xi32>
    %c3_i32 = arith.constant 3 : i32
    %83 = vector.broadcast %c3_i32 : i32 to vector<1x128xi32>
    %84 = arith.cmpi eq, %76, %83 : vector<1x128xi32>
    %c0_i32_19 = arith.constant 0 : i32
    %85 = vector.shape_cast %75 : vector<1x1xi32> to vector<1x1xi32>
    %86 = vector.broadcast %85 : vector<1x1xi32> to vector<1x128xi32>
    %87 = vector.broadcast %c0_i32_19 : i32 to vector<1x128xi32>
    %88 = arith.select %84, %86, %87 : vector<1x128xi1>, vector<1x128xi32>
    %89 = vector.shape_cast %70 : vector<1x1xi32> to vector<1x1xi32>
    %90 = vector.broadcast %89 : vector<1x1xi32> to vector<1x128xi32>
    %91 = arith.select %82, %90, %88 : vector<1x128xi1>, vector<1x128xi32>
    %92 = vector.shape_cast %65 : vector<1x1xi32> to vector<1x1xi32>
    %93 = vector.broadcast %92 : vector<1x1xi32> to vector<1x128xi32>
    %94 = arith.select %80, %93, %91 : vector<1x128xi1>, vector<1x128xi32>
    %95 = vector.shape_cast %63 : vector<1x1xi32> to vector<1x1xi32>
    %96 = vector.broadcast %95 : vector<1x1xi32> to vector<1x128xi32>
    %97 = arith.select %78, %96, %94 : vector<1x128xi1>, vector<1x128xi32>
    %c0_20 = arith.constant 0 : index
    %c0_21 = arith.constant 0 : index
    %98 = vector.load %arg3[%c0_20, %c0_21] : memref<1x128xi32, #tpu.memory_space<vmem>>, vector<1x128xi32>
    tpu.vector_store %arg3[%c0_20, %c0_21], %97 {strides = array<i32>} : memref<1x128xi32, #tpu.memory_space<vmem>>, vector<1x128xi32>,
    return
  }
  func.func @transform_0(%arg0: i32) -> (i32, i32) {
    %c0_i32 = arith.constant 0 : i32
    %c0_i32_0 = arith.constant 0 : i32
    %c0_i32_1 = arith.constant 0 : i32
    return %c0_i32, %c0_i32_0 : i32, i32
  }
  func.func @transform_1(%arg0: i32) -> (i32, i32) {
    %c0_i32 = arith.constant 0 : i32
    %c0_i32_0 = arith.constant 0 : i32
    %c0_i32_1 = arith.constant 0 : i32
    return %c0_i32, %c0_i32_0 : i32, i32
  }
  func.func @transform_2(%arg0: i32) -> (i32, i32) {
    %c0_i32 = arith.constant 0 : i32
    %c0_i32_0 = arith.constant 0 : i32
    %c0_i32_1 = arith.constant 0 : i32
    return %c0_i32, %c0_i32_0 : i32, i32
  }
}

module attributes {stable_mosaic.version = 11 : i64} {
  func.func @_mse_kernel(%arg0: i32, %arg1: memref<3x8x128xbf16, #tpu.memory_space<vmem>>, %arg2: memref<1x8x128xbf16, #tpu.memory_space<vmem>>, %arg3: memref<3x128xf32, #tpu.memory_space<vmem>>) attributes {dimension_semantics = [#tpu.dimension_semantics<arbitrary>], iteration_bounds = array<i64: 1>, scalar_prefetch = 0 : i64, scratch_operands = 0 : i64, tpu.core_type = #tpu.core_type<tc>, window_params = [{transform_indices = @transform_0, window_bounds = array<i64: 3, 8, 128>}, {transform_indices = @transform_1, window_bounds = array<i64: 1, 8, 128>}, {pipeline_mode = #tpu.pipeline_mode<synchronous>, transform_indices = @transform_2, window_bounds = array<i64: 3, 128>}]} {
    %c0_i32 = arith.constant 0 : i32
    %0 = arith.cmpi eq, %arg0, %c0_i32 : i32
    %1 = arith.extui %0 : i1 to i32
    %c0_i32_0 = arith.constant 0 : i32
    %2 = arith.cmpi ne, %1, %c0_i32_0 : i32
    scf.if %2 {
      %cst_10 = arith.constant 0.000000e+00 : f32
      %14 = vector.broadcast %cst_10 : f32 to vector<3x128xf32>
      %c0_11 = arith.constant 0 : index
      %c0_12 = arith.constant 0 : index
      %15 = vector.load %arg3[%c0_11, %c0_12] : memref<3x128xf32, #tpu.memory_space<vmem>>, vector<3x128xf32>
      tpu.vector_store %arg3[%c0_11, %c0_12], %14 {strides = array<i32>} : memref<3x128xf32, #tpu.memory_space<vmem>>, vector<3x128xf32>,
    } else {
    }
    %c0 = arith.constant 0 : index
    %c0_1 = arith.constant 0 : index
    %c0_2 = arith.constant 0 : index
    %3 = vector.load %arg1[%c0, %c0_1, %c0_2] : memref<3x8x128xbf16, #tpu.memory_space<vmem>>, vector<3x8x128xbf16>
    %4 = arith.extf %3 : vector<3x8x128xbf16> to vector<3x8x128xf32>
    %c0_3 = arith.constant 0 : index
    %c0_4 = arith.constant 0 : index
    %c0_5 = arith.constant 0 : index
    %5 = vector.load %arg2[%c0_3, %c0_4, %c0_5] : memref<1x8x128xbf16, #tpu.memory_space<vmem>>, vector<1x8x128xbf16>
    %6 = arith.extf %5 : vector<1x8x128xbf16> to vector<1x8x128xf32>
    %7 = vector.broadcast %6 : vector<1x8x128xf32> to vector<3x8x128xf32>
    %8 = arith.subf %4, %7 : vector<3x8x128xf32>
    %c0_6 = arith.constant 0 : index
    %c0_7 = arith.constant 0 : index
    %9 = vector.load %arg3[%c0_6, %c0_7] : memref<3x128xf32, #tpu.memory_space<vmem>>, vector<3x128xf32>
    %10 = arith.mulf %8, %8 : vector<3x8x128xf32>
    %cst = arith.constant dense<0.000000e+00> : vector<3x128xf32>
    %11 = vector.multi_reduction <add>, %10, %cst [1] : vector<3x8x128xf32> to vector<3x128xf32>
    %12 = arith.addf %9, %11 : vector<3x128xf32>
    %c0_8 = arith.constant 0 : index
    %c0_9 = arith.constant 0 : index
    %13 = vector.load %arg3[%c0_8, %c0_9] : memref<3x128xf32, #tpu.memory_space<vmem>>, vector<3x128xf32>
    tpu.vector_store %arg3[%c0_8, %c0_9], %12 {strides = array<i32>} : memref<3x128xf32, #tpu.memory_space<vmem>>, vector<3x128xf32>,
    return
  }
  func.func @transform_0(%arg0: i32) -> (i32, i32, i32) {
    %c0_i32 = arith.constant 0 : i32
    %c0_i32_0 = arith.constant 0 : i32
    %c0_i32_1 = arith.constant 0 : i32
    return %c0_i32, %arg0, %c0_i32_0 : i32, i32, i32
  }
  func.func @transform_1(%arg0: i32) -> (i32, i32, i32) {
    %c0_i32 = arith.constant 0 : i32
    %c0_i32_0 = arith.constant 0 : i32
    %c0_i32_1 = arith.constant 0 : i32
    return %c0_i32, %arg0, %c0_i32_0 : i32, i32, i32
  }
  func.func @transform_2(%arg0: i32) -> (i32, i32) {
    %c0_i32 = arith.constant 0 : i32
    %c0_i32_0 = arith.constant 0 : i32
    %c0_i32_1 = arith.constant 0 : i32
    return %c0_i32, %c0_i32_0 : i32, i32
  }
}

module attributes {stable_mosaic.version = 11 : i64} {
  func.func @_dilate_kernel(%arg0: i32, %arg1: memref<20x20xbf16, #tpu.memory_space<vmem>>, %arg2: memref<16x16xbf16, #tpu.memory_space<vmem>>) attributes {dimension_semantics = [#tpu.dimension_semantics<arbitrary>], iteration_bounds = array<i64: 1>, scalar_prefetch = 0 : i64, scratch_operands = 0 : i64, tpu.core_type = #tpu.core_type<tc>, window_params = [{pipeline_mode = #tpu.pipeline_mode<synchronous>, transform_indices = @transform_0, window_bounds = array<i64: 20, 20>}, {pipeline_mode = #tpu.pipeline_mode<synchronous>, transform_indices = @transform_1, window_bounds = array<i64: 16, 16>}]} {
    %c0 = arith.constant 0 : index
    %c0_0 = arith.constant 0 : index
    %0 = vector.load %arg1[%c0, %c0_0] : memref<20x20xbf16, #tpu.memory_space<vmem>>, vector<20x20xbf16>
    %1 = arith.extf %0 : vector<20x20xbf16> to vector<20x20xf32>
    %2 = vector.extract_strided_slice %1 {offsets = [0, 0], sizes = [19, 20], strides = [1, 1]} : vector<20x20xf32> to vector<19x20xf32>
    %3 = vector.extract_strided_slice %1 {offsets = [1, 0], sizes = [19, 20], strides = [1, 1]} : vector<20x20xf32> to vector<19x20xf32>
    %4 = arith.maximumf %2, %3 : vector<19x20xf32>
    %5 = vector.extract_strided_slice %4 {offsets = [0, 0], sizes = [17, 20], strides = [1, 1]} : vector<19x20xf32> to vector<17x20xf32>
    %6 = vector.extract_strided_slice %4 {offsets = [2, 0], sizes = [17, 20], strides = [1, 1]} : vector<19x20xf32> to vector<17x20xf32>
    %7 = arith.maximumf %5, %6 : vector<17x20xf32>
    %8 = vector.extract_strided_slice %7 {offsets = [0, 0], sizes = [16, 20], strides = [1, 1]} : vector<17x20xf32> to vector<16x20xf32>
    %9 = vector.extract_strided_slice %7 {offsets = [1, 0], sizes = [16, 20], strides = [1, 1]} : vector<17x20xf32> to vector<16x20xf32>
    %10 = arith.maximumf %8, %9 : vector<16x20xf32>
    %11 = vector.extract_strided_slice %10 {offsets = [0, 0], sizes = [16, 19], strides = [1, 1]} : vector<16x20xf32> to vector<16x19xf32>
    %12 = vector.extract_strided_slice %10 {offsets = [0, 1], sizes = [16, 19], strides = [1, 1]} : vector<16x20xf32> to vector<16x19xf32>
    %13 = arith.maximumf %11, %12 : vector<16x19xf32>
    %14 = vector.extract_strided_slice %13 {offsets = [0, 0], sizes = [16, 17], strides = [1, 1]} : vector<16x19xf32> to vector<16x17xf32>
    %15 = vector.extract_strided_slice %13 {offsets = [0, 2], sizes = [16, 17], strides = [1, 1]} : vector<16x19xf32> to vector<16x17xf32>
    %16 = arith.maximumf %14, %15 : vector<16x17xf32>
    %17 = vector.extract_strided_slice %16 {offsets = [0, 0], sizes = [16, 16], strides = [1, 1]} : vector<16x17xf32> to vector<16x16xf32>
    %18 = vector.extract_strided_slice %16 {offsets = [0, 1], sizes = [16, 16], strides = [1, 1]} : vector<16x17xf32> to vector<16x16xf32>
    %19 = arith.maximumf %17, %18 : vector<16x16xf32>
    %20 = arith.truncf %19 : vector<16x16xf32> to vector<16x16xbf16>
    %c0_1 = arith.constant 0 : index
    %c0_2 = arith.constant 0 : index
    %21 = vector.load %arg2[%c0_1, %c0_2] : memref<16x16xbf16, #tpu.memory_space<vmem>>, vector<16x16xbf16>
    tpu.vector_store %arg2[%c0_1, %c0_2], %20 {strides = array<i32>} : memref<16x16xbf16, #tpu.memory_space<vmem>>, vector<16x16xbf16>,
    return
  }
  func.func @transform_0(%arg0: i32) -> (i32, i32) {
    %c0_i32 = arith.constant 0 : i32
    %c0_i32_0 = arith.constant 0 : i32
    %c0_i32_1 = arith.constant 0 : i32
    return %c0_i32, %c0_i32_0 : i32, i32
  }
  func.func @transform_1(%arg0: i32) -> (i32, i32) {
    %c0_i32 = arith.constant 0 : i32
    %c0_i32_0 = arith.constant 0 : i32
    %c0_i32_1 = arith.constant 0 : i32
    return %c0_i32, %c0_i32_0 : i32, i32
  }
}

module attributes {stable_mosaic.version = 11 : i64} {
  func.func @_inpaint_fill_kernel(%arg0: i32, %arg1: i32, %arg2: memref<1x16x48xf32, #tpu.memory_space<vmem>>, %arg3: memref<1x16x48xbf16, #tpu.memory_space<vmem>>, %arg4: memref<1x16x48xf32, #tpu.memory_space<vmem>>) attributes {dimension_semantics = [#tpu.dimension_semantics<parallel>, #tpu.dimension_semantics<parallel>], iteration_bounds = array<i64: 4, 1>, scalar_prefetch = 0 : i64, scratch_operands = 0 : i64, tpu.core_type = #tpu.core_type<tc>, window_params = [{transform_indices = @transform_0, window_bounds = array<i64: 1, 16, 48>}, {transform_indices = @transform_1, window_bounds = array<i64: 1, 16, 48>}, {transform_indices = @transform_2, window_bounds = array<i64: 1, 16, 48>}]} {
    %c0 = arith.constant 0 : index
    %c0_0 = arith.constant 0 : index
    %c0_1 = arith.constant 0 : index
    %0 = vector.load %arg3[%c0, %c0_0, %c0_1] : memref<1x16x48xbf16, #tpu.memory_space<vmem>>, vector<1x16x48xbf16>
    %1 = arith.extf %0 : vector<1x16x48xbf16> to vector<1x16x48xf32>
    %cst = arith.constant 1.000000e+00 : f32
    %2 = vector.broadcast %cst : f32 to vector<1x16x48xf32>
    %3 = arith.subf %2, %1 : vector<1x16x48xf32>
    %c0_2 = arith.constant 0 : index
    %c0_3 = arith.constant 0 : index
    %c0_4 = arith.constant 0 : index
    %4 = vector.load %arg2[%c0_2, %c0_3, %c0_4] : memref<1x16x48xf32, #tpu.memory_space<vmem>>, vector<1x16x48xf32>
    %5 = arith.mulf %4, %3 : vector<1x16x48xf32>
    %c0_5 = arith.constant 0 : index
    %c0_6 = arith.constant 0 : index
    %c0_7 = arith.constant 0 : index
    %6 = vector.load %arg4[%c0_5, %c0_6, %c0_7] : memref<1x16x48xf32, #tpu.memory_space<vmem>>, vector<1x16x48xf32>
    tpu.vector_store %arg4[%c0_5, %c0_6, %c0_7], %5 {strides = array<i32>} : memref<1x16x48xf32, #tpu.memory_space<vmem>>, vector<1x16x48xf32>,
    return
  }
  func.func @transform_0(%arg0: i32, %arg1: i32) -> (i32, i32, i32) {
    %c0_i32 = arith.constant 0 : i32
    %c0_i32_0 = arith.constant 0 : i32
    return %arg0, %arg1, %c0_i32 : i32, i32, i32
  }
  func.func @transform_1(%arg0: i32, %arg1: i32) -> (i32, i32, i32) {
    %c0_i32 = arith.constant 0 : i32
    %c0_i32_0 = arith.constant 0 : i32
    return %arg0, %arg1, %c0_i32 : i32, i32, i32
  }
  func.func @transform_2(%arg0: i32, %arg1: i32) -> (i32, i32, i32) {
    %c0_i32 = arith.constant 0 : i32
    %c0_i32_0 = arith.constant 0 : i32
    return %arg0, %arg1, %c0_i32 : i32, i32, i32
  }
}

</mosaic_0001>

<bundles_post_ra>
// kernel: custom-call
= control target key start
LH: loop header
LB: loop body
LE: loop exit
PB: predicated region body
PF: predicated region fallthrough
CT: control target
= control target key end

     0   :  { %s6_s0 = inlined_call_operand.vmem [shape: bf16[3,16,16], index: 0, kind: output, shape index: {}]  }

// kernel: closed_call.16
= control target key start
LH: loop header
LB: loop body
LE: loop exit
PB: predicated region body
PF: predicated region fallthrough
CT: control target
= control target key end

     0   :  { %v68_v0 = vmov 0.0   ;;  %vm52_vm0 = vcmask 1041409   ;;  %vm54_vm1 = vcmask 1042434   ;;  %s102_s2 = inlined_call_operand.vmem [shape: f32[3,128], index: 2, kind: output, shape index: {}]   ;;  %s103_s0 = inlined_call_operand.vmem [shape: bf16[3,8,128], index: 0, kind: input, shape index: {}]   ;;  %s104_s1 = inlined_call_operand.vmem [shape: bf16[1,8,128], index: 1, kind: input, shape index: {}]  }
   0x1   :  { %15 = vst [vmem:[%s102_s2] sm:$0x7] %v68_v0  ;;  %v64_v1 = vld [vmem:[%s103_s0] sm:$0xff]   ;;  %v18_v2 = vld [vmem:[%s103_s0 + $0x8] sm:$0xf] }
   0x2   :  { %v22_v3 = vld [vmem:[%s104_s1] sm:$0xf]  ;;  %v65_v4 = vunpack.c.l.bf16 %v64_v1  ;;  %v66_v5 = vunpack.c.h.bf16 %v64_v1  ;;  %v21_v6 = vunpack.c.l.bf16 %v18_v2 }
   0x3   :  { %v23_v7 = vunpack.c.l.bf16 %v22_v3 }
   0x5   :  { %v24_v8 = vsub.f32 %v65_v4, %v23_v7  ;;  %v25_v9 = vsub.f32 %v66_v5, %v23_v7  ;;  %v26_v10 = vsub.f32 %v21_v6, %v23_v7 }
   0x7   :  { %v28_v11 = vmul.f32 %v24_v8, %v24_v8  ;;  %v29_v12 = vmul.f32 %v25_v9, %v25_v9  ;;  %v30_v13 = vmul.f32 %v26_v10, %v26_v10 }
   0x8   :  { %v27_v32 = vld [vmem:[%s102_s2] sm:$0x7] }
   0x9   :  { %v31_v14 = vrot.slane %v28_v11, 4  ;;  %v37_v15 = vrot.slane %v29_v12, 4  ;;  %v43_v16 = vrot.slane %v30_v13, 4 }
   0xb   :  { %v32_v17 = vadd.f32 %v31_v14, %v28_v11  ;;  %v38_v18 = vadd.f32 %v37_v15, %v29_v12  ;;  %v44_v19 = vadd.f32 %v43_v16, %v30_v13 }
   0xd   :  { %v33_v20 = vrot.slane %v32_v17, 2  ;;  %v39_v21 = vrot.slane %v38_v18, 2  ;;  %v45_v22 = vrot.slane %v44_v19, 2 }
   0xf   :  { %v34_v23 = vadd.f32 %v33_v20, %v32_v17  ;;  %v40_v24 = vadd.f32 %v39_v21, %v38_v18  ;;  %v46_v25 = vadd.f32 %v45_v22, %v44_v19 }
  0x11   :  { %v35_v26 = vrot.slane %v34_v23, 1  ;;  %v41_v27 = vrot.slane %v40_v24, 1  ;;  %v47_v28 = vrot.slane %v46_v25, 1 }
  0x13   :  { %v36_v29 = vadd.f32 %v35_v26, %v34_v23  ;;  %v42_v30 = vadd.f32 %v41_v27, %v40_v24  ;;  %v48_v31 = vadd.f32 %v47_v28, %v46_v25 }
  0x15   :  { %v53_v33 = vsel %vm52_vm0, %v42_v30, %v36_v29 }
  0x16   :  { %v55_v34 = vsel %vm54_vm1, %v48_v31, %v53_v33 }
  0x17   :  { %v57_v35 = vadd.f32 %v55_v34, %v27_v32 }
  0x19   :  { %58 = vst [vmem:[%s102_s2] sm:$0x7] %v57_v35 }

// kernel: _forward_impl.2
= control target key start
LH: loop header
LB: loop body
LE: loop exit
PB: predicated region body
PF: predicated region fallthrough
CT: control target
= control target key end

     0   :  { %vm19_vm0 = vcmask 1046528   ;;  %vm34_vm1 = vcmask 1045504   ;;  %s237_s13 = smov 126   ;;  %vm93_vm2 = vcmask 130048   ;;  %vm90_vm3 = vcmask 125952   ;;  %s284_s0 = inlined_call_operand.vmem [shape: bf16[20,20], index: 0, kind: input, shape index: {}]   ;;  %s285_s1 = inlined_call_operand.vmem [shape: bf16[16,16], index: 1, kind: output, shape index: {0}]   ;;  %s286_s2 = inlined_call_operand.vmem [shape: s32[1,128], index: 2, kind: output, shape index: {1}]  }
   0x1   :  { %v208_v0 = vld [vmem:[%s284_s0] sm:$0xff]   ;;  %v12_v1 = vld [vmem:[%s284_s0 + $0x8] sm:$0x3]  ;;  %s236_s0 = smov 127   ;;  %v110_v54 = vlaneseq }
   0x2   :  { %v209_v2 = vunpack.c.l.bf16 %v208_v0  ;;  %v210_v3 = vunpack.c.h.bf16 %v208_v0  ;;  %v15_v4 = vunpack.c.l.bf16 %v12_v1 }
   0x3   :  { %v271_v57 = vand.u32 127, %v110_v54 }
   0x4   :  { %v20_v5 = vrot.slane %v209_v2, 1  ;;  %v21_v6 = vrot.slane %v210_v3, 1  ;;  %v23_v7 = vrot.slane %v15_v4, 1 }
   0x6   :  { %v22_v8 = vsel %vm19_vm0, %v20_v5, %v21_v6  ;;  %v24_v9 = vsel %vm19_vm0, %v21_v6, %v23_v7  ;;  %v30_v10 = vmax.f32 %v15_v4, %v23_v7 }
   0x7   :  { %v28_v11 = vmax.f32 %v209_v2, %v22_v8  ;;  %v29_v12 = vmax.f32 %v210_v3, %v24_v9 }
   0x8   :  { %v38_v13 = vrot.slane %v30_v10, 2 }
   0x9   :  { %v35_v14 = vrot.slane %v28_v11, 2  ;;  %v36_v15 = vrot.slane %v29_v12, 2 }
   0xa   :  { %v45_v16 = vmax.f32 %v30_v10, %v38_v13 }
   0xb   :  { %v37_v17 = vsel %vm34_vm1, %v35_v14, %v36_v15  ;;  %v39_v18 = vsel %vm34_vm1, %v36_v15, %v38_v13 }
   0xc   :  { %v43_v19 = vmax.f32 %v28_v11, %v37_v17  ;;  %v44_v20 = vmax.f32 %v29_v12, %v39_v18  ;;  %v52_v21 = vrot.slane %v45_v16, 1  ;;  %v113_v11 = vshrl.u32 %v110_v54, 7 }
   0xe   :  { %v49_v22 = vrot.slane %v43_v19, 1  ;;  %v50_v23 = vrot.slane %v44_v20, 1  ;;  %v114_v14 = vadd.s32 8, %v113_v11 }
  0x10   :  { %v51_v24 = vsel %vm19_vm0, %v49_v22, %v50_v23  ;;  %v53_v25 = vsel %vm19_vm0, %v50_v23, %v52_v21 }
  0x11   :  { %v56_v26 = vmax.f32 %v43_v19, %v51_v24  ;;  %v57_v27 = vmax.f32 %v44_v20, %v53_v25 }
  0x13   :  { %v221_v28 = vpack.i.bf16 %v57_v27, %v56_v26 }
  0x15   :  { %222 = vrot.lane.b32.xlu0 %v221_v28, %s236_s0 }
  0x87   :  { %v223_v29 = vpop.permute.xlu0 %222 }
  0x88   :  { %v225_v30 = vunpack.i.h.bf16 %v223_v29  ;;  %v224_v31 = vunpack.i.l.bf16 %v223_v29 }
  0x8a   :  { %v67_v32 = vmax.f32 %v57_v27, %v225_v30  ;;  %v66_v33 = vmax.f32 %v56_v26, %v224_v31 }
  0x8c   :  { %v226_v34 = vpack.i.bf16 %v67_v32, %v66_v33 }
  0x8e   :  { %227 = vrot.lane.b32.xlu0 %v226_v34, %s237_s13 }
 0x100   :  { %v228_v35 = vpop.permute.xlu0 %227 }
 0x101   :  { %v230_v36 = vunpack.i.h.bf16 %v228_v35  ;;  %v229_v37 = vunpack.i.l.bf16 %v228_v35 }
 0x103   :  { %v76_v38 = vmax.f32 %v66_v33, %v229_v37  ;;  %v77_v39 = vmax.f32 %v67_v32, %v230_v36 }
 0x105   :  { %v231_v40 = vpack.i.bf16 %v77_v39, %v76_v38 }
 0x107   :  { %232 = vrot.lane.b32.xlu1 %v231_v40, %s236_s0 }
 0x179   :  { %v233_v41 = vpop.permute.xlu1 %232 }
 0x17a   :  { %v235_v42 = vunpack.i.h.bf16 %v233_v41  ;;  %v234_v43 = vunpack.i.l.bf16 %v233_v41 }
 0x17c   :  { %v86_v44 = vmax.f32 %v76_v38, %v234_v43  ;;  %v87_v45 = vmax.f32 %v77_v39, %v235_v42 }
 0x17e   :  { %v88_v46 = vpack.c.bf16 %v86_v44, %v86_v44  ;;  %v95_v47 = vsel %vm93_vm2, %v87_v45, -inf  ;;  %v89_v48 = vpack.c.bf16 %v87_v45, %v87_v45  ;;  %v94_v49 = vsel %vm93_vm2, %v86_v44, -inf }
 0x17f   :  { %106 = vmax.xlane.f32.xlu0 %v95_v47  ;;  %v96_v50 = vmax.f32 %v94_v49, %v95_v47 }
 0x180   :  { %91 = vst.msk [vmem:[%s285_s1] sm:$0xf] %vm90_vm3, %v88_v46 }
 0x181   :  { %92 = vst.msk [vmem:[%s285_s1 + $0x4] sm:$0xf] %vm90_vm3, %v89_v48  ;;  %v97_v51 = vrot.slane %v96_v50, 4  ;;  %vm192_vm3 = vcmp.eq.s32.totalorder %v271_v57, 2 }
 0x183   :  { %v98_v52 = vmax.f32 %v96_v50, %v97_v51 }
 0x185   :  { %v99_v53 = vrot.slane %v98_v52, 2 }
 0x187   :  { %v100_v55 = vmax.f32 %v98_v52, %v99_v53 }
 0x189   :  { %v101_v56 = vrot.slane %v100_v55, 1 }
 0x18b   :  { %v102_v58 = vmax.f32 %v100_v55, %v101_v56 }
 0x18d   :  { %vm103_vm4 = vcmp.gt.f32.partialorder %v102_v58, 0.0 }
 0x18e   :  { %v133_v59 = vsel %vm103_vm4, %v271_v57, 4294967295  ;;  %v115_v60 = vsel %vm103_vm4, %v271_v57, 1073741824  ;;  %vm191_vm4 = vcmp.eq.s32.totalorder %v271_v57, 1 }
 0x18f   :  { %v134_v61 = vsel %vm93_vm2, %v133_v59, 2147483648  ;;  %v116_v62 = vsel %vm93_vm2, %v115_v60, 2147483647  ;;  %vm193_vm2 = vcmp.eq.s32.totalorder %v271_v57, 3 }
 0x190   :  { %v136_v63 = vshra.s32 %v134_v61, 16  ;;  %v118_v0 = vshra.s32 %v116_v62, 16  ;;  %v117_v3 = vand.u32 65535, %v116_v62  ;;  %v135_v8 = vand.u32 65535, %v134_v61 }
 0x192   :  { %v138_v1 = vcvt.s32.f32 %v136_v63  ;;  %v120_v2 = vcvt.s32.f32 %v118_v0  ;;  %v119_v5 = vcvt.s32.f32 %v117_v3  ;;  %v137_v9 = vcvt.s32.f32 %v135_v8 }
 0x194   :  { %139 = vmax.xlane.f32.xlu2 %v138_v1  ;;  %121 = vmin.xlane.f32.xlu1 %v120_v2 }
 0x19c   :  { %104 = vmax.xlane.f32.xlu2 %v94_v49 }
 0x1f2   :  { %v107_v13 = vpop.xlane.xlu0 %106 }
 0x1f3   :  { %vm109_vm8 = vcmp.gt.f32.partialorder %v107_v13, 0.0 }
 0x1f4   :  { %v152_v17 = vsel %vm109_vm8, %v114_v14, 1073741824  ;;  %v167_v18 = vsel %vm109_vm8, %v114_v14, 4294967295 }
 0x207   :  { %v122_v4 = vpop.xlane.xlu1 %121  ;;  %v140_v7 = vpop.xlane.xlu2 %139 }
 0x208   :  { %vm123_vm5 = vcmp.eq.f32.partialorder %v120_v2, %v122_v4  ;;  %vm141_vm6 = vcmp.eq.f32.partialorder %v138_v1, %v140_v7  ;;  %v128_v26 = vcvt.f32.s32 %v122_v4  ;;  %v146_v34 = vcvt.f32.s32 %v140_v7 }
 0x209   :  { %v124_v6 = vsel %vm123_vm5, %v119_v5, inf  ;;  %v142_v10 = vsel %vm141_vm6, %v137_v9, -inf  ;;  %vm190_vm5 = vcmp.eq.s32.totalorder %v271_v57, 0 }
 0x20a   :  { %125 = vmin.xlane.f32.xlu2 %v124_v6  ;;  %v129_v29 = vshll.u32 %v128_v26, 16  ;;  %v147_v38 = vshll.u32 %v146_v34, 16 }
 0x20f   :  { %v105_v12 = vpop.xlane.xlu2 %104 }
 0x210   :  { %vm108_vm7 = vcmp.gt.f32.partialorder %v105_v12, 0.0 }
 0x211   :  { %v151_v15 = vsel %vm108_vm7, %v113_v11, 1073741824  ;;  %v166_v16 = vsel %vm108_vm7, %v113_v11, 4294967295 }
 0x212   :  { %143 = vmax.xlane.f32.xlu2 %v142_v10  ;;  %vm153_vm9 = vcmp.lt.s32.totalorder %v151_v15, %v152_v17  ;;  %vm168_vm10 = vcmp.gt.s32.totalorder %v166_v16, %v167_v18 }
 0x213   :  { %v154_v19 = vsel %vm153_vm9, %v151_v15, %v152_v17  ;;  %v169_v20 = vsel %vm168_vm10, %v166_v16, %v167_v18 }
 0x214   :  { %v155_v21 = vrot.slane %v154_v19, 4  ;;  %v170_v22 = vrot.slane %v169_v20, 4 }
 0x216   :  { %vm156_vm11 = vcmp.lt.s32.totalorder %v154_v19, %v155_v21  ;;  %vm171_vm12 = vcmp.gt.s32.totalorder %v169_v20, %v170_v22 }
 0x217   :  { %v157_v23 = vsel %vm156_vm11, %v154_v19, %v155_v21  ;;  %v172_v24 = vsel %vm171_vm12, %v169_v20, %v170_v22 }
 0x218   :  { %v158_v25 = vrot.slane %v157_v23, 2  ;;  %v173_v27 = vrot.slane %v172_v24, 2 }
 0x21a   :  { %vm159_vm13 = vcmp.lt.s32.totalorder %v157_v23, %v158_v25  ;;  %vm174_vm14 = vcmp.gt.s32.totalorder %v172_v24, %v173_v27 }
 0x21b   :  { %v160_v32 = vsel %vm159_vm13, %v157_v23, %v158_v25  ;;  %v175_v33 = vsel %vm174_vm14, %v172_v24, %v173_v27 }
 0x21c   :  { %v161_v35 = vrot.slane %v160_v32, 1  ;;  %v176_v36 = vrot.slane %v175_v33, 1 }
 0x21e   :  { %vm162_vm15 = vcmp.lt.s32.totalorder %v160_v32, %v161_v35  ;;  %vm177_vm0 = vcmp.gt.s32.totalorder %v175_v33, %v176_v36 }
 0x21f   :  { %v163_v41 = vsel %vm162_vm15, %v160_v32, %v161_v35  ;;  %v178_v42 = vsel %vm177_vm0, %v175_v33, %v176_v36 }
 0x27d   :  { %v126_v28 = vpop.xlane.xlu2 %125 }
 0x27e   :  { %v127_v30 = vcvt.f32.s32 %v126_v28 }
 0x280   :  { %v130_v31 = vadd.s32 %v129_v29, %v127_v30 }
 0x282   :  { %211 = vpush %v130_v31 }
 0x285   :  { %v144_v37 = vpop.xlane.xlu2 %143 }
 0x286   :  { %v145_v39 = vcvt.f32.s32 %v144_v37 }
 0x288   :  { %v148_v40 = vadd.s32 %v147_v38, %v145_v39 }
 0x28a   :  { %213 = vpush %v148_v40 }
 0x28b   :  { %215 = vpush %v163_v41 }
 0x28c   :  { %217 = vpush %v178_v42 }
 0x2b3   :  { %s212_s1 = spop %211 }
 0x2b4   :  { %v132_v43 = vstv %s212_s1 }
 0x2bb   :  { %s214_s18 = spop %213 }
 0x2bc   :  { %v150_v44 = vstv %s214_s18  ;;  %s216_s19 = spop %215 }
 0x2bd   :  { %v184_v45 = vsub.s32 %v150_v44, %v132_v43  ;;  %v165_v46 = vstv %s216_s19  ;;  %s218_s20 = spop %217 }
 0x2be   :  { %v180_v47 = vstv %s218_s20 }
 0x2bf   :  { %v185_v48 = vadd.s32 1, %v184_v45  ;;  %v187_v49 = vsub.s32 %v180_v47, %v165_v46  ;;  %vm181_vm1 = vcmp.ge.s32.totalorder %v180_v47, 0 }
 0x2c0   :  { %v183_v54 = vsel %vm181_vm1, %v165_v46, 0  ;;  %v182_v56 = vsel %vm181_vm1, %v132_v43, 0 }
 0x2c1   :  { %v188_v50 = vadd.s32 1, %v187_v49  ;;  %v186_v51 = vsel %vm181_vm1, %v185_v48, 0 }
 0x2c3   :  { %v189_v52 = vsel %vm181_vm1, %v188_v50, 0 }
 0x2c4   :  { %v194_v53 = vsel %vm193_vm2, %v189_v52, 0 }
 0x2c5   :  { %v195_v55 = vsel %vm192_vm3, %v186_v51, %v194_v53 }
 0x2c6   :  { %v196_v58 = vsel %vm191_vm4, %v183_v54, %v195_v55 }
 0x2c7   :  { %v197_v59 = vsel %vm190_vm5, %v182_v56, %v196_v58 }
 0x2c8   :  { %198 = vst [vmem:[%s286_s2] sm:$0x1] %v197_v59 }

// kernel: closed_call.17
= control target key start
LH: loop header
LB: loop body
LE: loop exit
PB: predicated region body
PF: predicated region fallthrough
CT: control target
= control target key end

     0   :  { %vm17_vm0 = vcmask 1046528   ;;  %vm32_vm1 = vcmask 1045504   ;;  %s117_s10 = smov 126   ;;  %vm88_vm2 = vcmask 125952   ;;  %s144_s0 = inlined_call_operand.vmem [shape: bf16[20,20], index: 0, kind: input, shape index: {}]   ;;  %s145_s1 = inlined_call_operand.vmem [shape: bf16[16,16], index: 1, kind: output, shape index: {}]  }
   0x1   :  { %v96_v0 = vld [vmem:[%s144_s0] sm:$0xff]   ;;  %v10_v1 = vld [vmem:[%s144_s0 + $0x8] sm:$0x3]  ;;  %s116_s0 = smov 127  }
   0x2   :  { %v97_v2 = vunpack.c.l.bf16 %v96_v0  ;;  %v98_v3 = vunpack.c.h.bf16 %v96_v0  ;;  %v13_v4 = vunpack.c.l.bf16 %v10_v1 }
   0x4   :  { %v18_v5 = vrot.slane %v97_v2, 1  ;;  %v19_v6 = vrot.slane %v98_v3, 1  ;;  %v21_v7 = vrot.slane %v13_v4, 1 }
   0x6   :  { %v20_v8 = vsel %vm17_vm0, %v18_v5, %v19_v6  ;;  %v22_v9 = vsel %vm17_vm0, %v19_v6, %v21_v7  ;;  %v28_v10 = vmax.f32 %v13_v4, %v21_v7 }
   0x7   :  { %v26_v11 = vmax.f32 %v97_v2, %v20_v8  ;;  %v27_v12 = vmax.f32 %v98_v3, %v22_v9 }
   0x8   :  { %v36_v13 = vrot.slane %v28_v10, 2 }
   0x9   :  { %v33_v14 = vrot.slane %v26_v11, 2  ;;  %v34_v15 = vrot.slane %v27_v12, 2 }
   0xa   :  { %v43_v16 = vmax.f32 %v28_v10, %v36_v13 }
   0xb   :  { %v35_v17 = vsel %vm32_vm1, %v33_v14, %v34_v15  ;;  %v37_v18 = vsel %vm32_vm1, %v34_v15, %v36_v13 }
   0xc   :  { %v41_v19 = vmax.f32 %v26_v11, %v35_v17  ;;  %v42_v20 = vmax.f32 %v27_v12, %v37_v18  ;;  %v50_v21 = vrot.slane %v43_v16, 1 }
   0xe   :  { %v47_v22 = vrot.slane %v41_v19, 1  ;;  %v48_v23 = vrot.slane %v42_v20, 1 }
  0x10   :  { %v49_v24 = vsel %vm17_vm0, %v47_v22, %v48_v23  ;;  %v51_v25 = vsel %vm17_vm0, %v48_v23, %v50_v21 }
  0x11   :  { %v54_v26 = vmax.f32 %v41_v19, %v49_v24  ;;  %v55_v27 = vmax.f32 %v42_v20, %v51_v25 }
  0x13   :  { %v101_v28 = vpack.i.bf16 %v55_v27, %v54_v26 }
  0x15   :  { %102 = vrot.lane.b32.xlu0 %v101_v28, %s116_s0 }
  0x87   :  { %v103_v29 = vpop.permute.xlu0 %102 }
  0x88   :  { %v105_v30 = vunpack.i.h.bf16 %v103_v29  ;;  %v104_v31 = vunpack.i.l.bf16 %v103_v29 }
  0x8a   :  { %v65_v32 = vmax.f32 %v55_v27, %v105_v30  ;;  %v64_v33 = vmax.f32 %v54_v26, %v104_v31 }
  0x8c   :  { %v106_v34 = vpack.i.bf16 %v65_v32, %v64_v33 }
  0x8e   :  { %107 = vrot.lane.b32.xlu0 %v106_v34, %s117_s10 }
 0x100   :  { %v108_v35 = vpop.permute.xlu0 %107 }
 0x101   :  { %v110_v36 = vunpack.i.h.bf16 %v108_v35  ;;  %v109_v37 = vunpack.i.l.bf16 %v108_v35 }
 0x103   :  { %v75_v38 = vmax.f32 %v65_v32, %v110_v36  ;;  %v74_v39 = vmax.f32 %v64_v33, %v109_v37 }
 0x105   :  { %v111_v40 = vpack.i.bf16 %v75_v38, %v74_v39 }
 0x107   :  { %112 = vrot.lane.b32.xlu1 %v111_v40, %s116_s0 }
 0x179   :  { %v113_v41 = vpop.permute.xlu1 %112 }
 0x17a   :  { %v115_v42 = vunpack.i.h.bf16 %v113_v41  ;;  %v114_v43 = vunpack.i.l.bf16 %v113_v41 }
 0x17c   :  { %v85_v44 = vmax.f32 %v75_v38, %v115_v42  ;;  %v84_v45 = vmax.f32 %v74_v39, %v114_v43 }
 0x17e   :  { %v87_v46 = vpack.c.bf16 %v85_v44, %v85_v44  ;;  %v86_v47 = vpack.c.bf16 %v84_v45, %v84_v45 }
 0x180   :  { %90 = vst.msk [vmem:[%s145_s1 + $0x4] sm:$0xf] %vm88_vm2, %v87_v46 }
 0x181   :  { %89 = vst.msk [vmem:[%s145_s1] sm:$0xf] %vm88_vm2, %v86_v47 }

// kernel: _forward_impl.3
= control target key start
LH: loop header
LB: loop body
LE: loop exit
PB: predicated region body
PF: predicated region fallthrough
CT: control target
= control target key end

     0   :  { %s420_s9 = smov 0   ;;  %s422_s10 = smov 0   ;;  %s453_s0 = inlined_call_operand.vmem [shape: f32[4,16,48], index: 0, kind: input, shape index: {}, may-alias: {0,2}]   ;;  %s454_s1 = inlined_call_operand.vmem [shape: bf16[4,16,48], index: 1, kind: input, shape index: {}]   ;;  %s455_s2 = inlined_call_operand.vmem [shape: f32[4,16,48], index: 2, kind: output, shape index: {}, may-alias: {0,2}]  }
   0x1   :  { %s424_s11 = smov 0  }
   0x2 LB: > { %s24_s12 = sadd.s32 1, %s399_s10  ;;  %p341_p0 = scmp.ge.s32.totalorder %s403_s11, 1  ;;  %s403_s11 = sphi %s424_s11, %s12_s11   ;;  %s399_s10 = sphi %s422_s10, %s457_s10   ;;  %s395_s9 = sphi %s420_s9, %s456_s9  }
   0x3   : > { %p26_p1 = scmp.ge.s32.totalorder %s24_s12, 4  ;;  %p150_p2 = scmp.lt.s32.totalorder %s403_s11, 5 }
   0x5   : > { %s459_s12 = smov (%p26_p1, %s24_s12), 0  ;;  %p151_p3 = pnand %p341_p0, %p150_p2 }
   0x6   : > { %p190_p4 = scmp.lt.s32.totalorder (!%p151_p3), %s395_s9, 3 }
   0x7   : > { %154 = sbr.rel (%p151_p3) target bundleno = 24 (0x18), region = 28 }
   0xc   : > { %s461_s9 = smov (!%p190_p4, %s395_s9), 3  ;;  %vm229_vm0 = vcmask 392192  }
   0xd   : > { %s350_s13 = sshll.u32 %s461_s9, 4  ;;  %s351_s14 = sshll.u32 %s461_s9, 3 }
   0xe   : > { %s197_s17 = scalar_lea.vmem %s453_s0, %s350_s13  ;;  %s207_s20 = scalar_lea.vmem %s454_s1, %s351_s14 }
   0xf   : > { %v354_v0 = vld [vmem:[%s207_s20] sm:$0xff]   ;;  %v226_v4 = vld [vmem:[%s197_s17 + $0x8] sm:$0xff]  ;;  %s217_s23 = scalar_lea.vmem %s455_s2, %s350_s13 }
  0x10   : > { %v355_v1 = vunpack.c.l.bf16 %v354_v0  ;;  %v356_v2 = vunpack.c.h.bf16 %v354_v0  ;;  %v225_v3 = vld [vmem:[%s197_s17] sm:$0xff] }
  0x12   : > { %v223_v5 = vsub.f32 1.0, %v355_v1  ;;  %v224_v6 = vsub.f32 1.0, %v356_v2 }
  0x14   : > { %v227_v7 = vmul.f32 %v225_v3, %v223_v5  ;;  %v228_v8 = vmul.f32 %v226_v4, %v224_v6 }
  0x16   : > { %230 = vst.msk [vmem:[%s217_s23] sm:$0xff] %vm229_vm0, %v227_v7 }
  0x17   : > { %231 = vst.msk [vmem:[%s217_s23 + $0x8] sm:$0xff] %vm229_vm0, %v228_v8 }
  0x18 PF: > { %s12_s11 = sadd.s32 1, %s403_s11   ;;  %s456_s9 = smov %s399_s10 }
  0x19   : > { %p9_p5 = scmp.ge.s32.totalorder %s12_s11, 6   ;;  %s457_s10 = smov %s459_s12 }
  0x1b   :  { %11 = sbr.rel (!%p9_p5) target bundleno = 2 (0x2), region = 61 }

</bundles_post_ra>
